<compile_context>
chip_gen: v7x
topology: tpu7x:2x2x1
jax: 0.10.0
libtpu: 0.0.40
codegen_flags: <defaults>
</compile_context>

<pallas_src>
import functools
import math

import jax
import jax.numpy as jnp
from jax.experimental import pallas as pl
from jax.experimental.pallas import tpu as pltpu

TOKENS_PER_BLOCK = 1024      # lane/sublane-dense output tiles; shrunk for tiny inputs
VOCAB_ROWS_PER_BLOCK = 512   # stacked-vocab (reduction) tile; keeps big tables off VMEM


def _round_up(n: int, m: int) -> int:
    return ((n + m - 1) // m) * m


def _onehot_gather_kernel(idx_ref, table_ref, out_ref, *, plane_offset):
    # idx_ref:   VMEM (T, 1)   int32  token indices for this token tile
    # table_ref: VMEM (TV, E)  bf16   one vocab-block of the stacked hi/lo table
    # out_ref:   VMEM (T, E)   f32    output tile; revisited (accumulated) over kv
    kv = pl.program_id(1)
    t = out_ref.shape[0]
    tv = table_ref.shape[0]

    idx = idx_ref[...]                                                  # (T, 1)
    # Global stacked-table row id covered by this vocab block.
    row = kv * tv + jax.lax.broadcasted_iota(jnp.int32, (t, tv), 1)     # (T, TV)
    # Two hits per token: hi plane at `idx`, lo plane at `idx + plane_offset`;
    # the single bf16 matmul then yields hi+lo (~f32) in the f32 accumulator.
    hit = (row == idx) | (row == idx + plane_offset)
    one_hot = hit.astype(jnp.float32).astype(jnp.bfloat16)              # (T, TV)

    contrib = jnp.dot(one_hot, table_ref[...],
                      preferred_element_type=jnp.float32)               # (T, E)

    @pl.when(kv == 0)
    def _():
        out_ref[...] = contrib.astype(out_ref.dtype)

    @pl.when(kv != 0)
    def _():
        out_ref[...] = out_ref[...] + contrib.astype(out_ref.dtype)


def embedding_lookup(ids, table, *, tokens_per_block: int = TOKENS_PER_BLOCK,
                     vocab_rows_per_block: int = VOCAB_ROWS_PER_BLOCK):
    """Pallas equivalent of torch.nn.Embedding(table)(ids); ids is any int shape."""
    v, e = table.shape
    lead_shape = ids.shape
    n = math.prod(lead_shape) if lead_shape else 1

    # --- table: split f32 into hi/lo bf16 planes, stacked along the vocab axis ---
    table_f32 = table.astype(jnp.float32)
    hi = table_f32.astype(jnp.bfloat16)
    lo = (table_f32 - hi.astype(jnp.float32)).astype(jnp.bfloat16)
    planes = jnp.concatenate([hi, lo], axis=0)                 # (2V, E) bf16

    rows = 2 * v
    tv = min(vocab_rows_per_block, _round_up(rows, 8))
    rows_pad = _round_up(rows, tv)
    if rows_pad != rows:
        planes = jnp.pad(planes, ((0, rows_pad - rows), (0, 0)))
    n_vblocks = rows_pad // tv

    # --- indices: flatten, pad to a sublane-aligned token tile ---
    t = min(tokens_per_block, _round_up(n, 8))
    n_pad = _round_up(n, t)
    flat_idx = ids.reshape(n).astype(jnp.int32)
    if n_pad != n:
        flat_idx = jnp.pad(flat_idx, (0, n_pad - n))           # pad rows gather row 0
    idx_col = flat_idx.reshape(n_pad, 1)
    n_tiles = n_pad // t

    kernel = functools.partial(_onehot_gather_kernel, plane_offset=v)

    out_flat = pl.pallas_call(
        kernel,
        out_shape=jax.ShapeDtypeStruct((n_pad, e), jnp.float32),
        grid_spec=pltpu.PrefetchScalarGridSpec(
            num_scalar_prefetch=0,
            grid=(n_tiles, n_vblocks),                         # reduction axis last
            in_specs=[
                pl.BlockSpec((t, 1), lambda i, kv: (i, 0)),    # token indices
                pl.BlockSpec((tv, e), lambda i, kv: (kv, 0)),  # vocab block (bf16)
            ],
            out_specs=pl.BlockSpec((t, e), lambda i, kv: (i, 0)),
        ),
        compiler_params=pltpu.CompilerParams(
            dimension_semantics=("parallel", "arbitrary"),
        ),
        cost_estimate=pl.CostEstimate(
            flops=2 * n_pad * rows_pad * e,
            transcendentals=0,
            bytes_accessed=n_pad * 4 + n_tiles * rows_pad * e * 2 + n_pad * e * 4,
        ),
    )(idx_col, planes)

    if n_pad != n:
        out_flat = out_flat[:n]
    return out_flat.reshape(*lead_shape, e)


def fused_embedding_lookup(ids_list, tables_list, **kwargs):
    """Fused lookup across several embedding tables sharing the hidden size.

    Stacks the tables along the vocab axis, offsets each field's indices, runs a
    single Pallas gather over the concatenated token stream, and splits the
    result back per field.  (Review item: fill MXU K / amortize launches.)
    """
    e = tables_list[0].shape[1]
    offsets, off = [], 0
    for tb in tables_list:
        offsets.append(off)
        off += tb.shape[0]
    stacked_table = jnp.concatenate([tb.astype(jnp.float32) for tb in tables_list], axis=0)

    sizes = [math.prod(ids.shape) if ids.shape else 1 for ids in ids_list]
    all_ids = jnp.concatenate(
        [ids.reshape(-1).astype(jnp.int32) + offsets[i] for i, ids in enumerate(ids_list)])

    out = embedding_lookup(all_ids, stacked_table, **kwargs)

    outs, pos = [], 0
    for ids, sz in zip(ids_list, sizes):
        outs.append(out[pos:pos + sz].reshape(*ids.shape, e))
        pos += sz
    return outs


# TODO(synk): remaining EHREmbedding pieces (ConceptEmbedding token-type routed
# scatter, TimeEmbedding / ValueEmbedding MLPs, sum + concat + LayerNorm +
# dropout) are not fused here; this kernel covers the nn.Embedding table lookups.


def _sinusoid_table(max_len: int, hidden: int):
    # Matches PositionalEmbedding._init_posi_embedding.
    pos = jnp.arange(max_len, dtype=jnp.float32)[:, None]
    idx = jnp.arange(hidden, dtype=jnp.float32)[None, :]
    angle = pos / jnp.power(10000.0, 2.0 * idx / hidden)
    even = (jnp.arange(hidden)[None, :] % 2) == 0
    return jnp.where(even, jnp.sin(angle), jnp.cos(angle)).astype(jnp.float32)


if __name__ == "__main__":
    hidden = 128
    B, S = 2, 8
    continuous_size, max_age, gender_size, task_size, unit_size, max_len = 64, 128, 4, 8, 16, 512

    key = jax.random.PRNGKey(0)
    ks = jax.random.split(key, 12)

    # Embedding tables (nn.Embedding weights ~ N(0,1); positional is sinusoidal).
    cont_tb = jax.random.normal(ks[0], (continuous_size, hidden), jnp.float32)
    age_tb = jax.random.normal(ks[1], (max_age, hidden), jnp.float32)
    gen_tb = jax.random.normal(ks[2], (gender_size, hidden), jnp.float32)
    task_tb = jax.random.normal(ks[3], (task_size, hidden), jnp.float32)
    unit_tb = jax.random.normal(ks[4], (unit_size, hidden), jnp.float32)
    pos_tb = _sinusoid_table(max_len, hidden)

    # Index inputs matching the EHREmbedding forward signature shapes.
    cont_ids = jax.random.randint(ks[5], (B, S), 0, continuous_size, dtype=jnp.int32)
    unit_ids = jax.random.randint(ks[6], (B, S), 0, unit_size, dtype=jnp.int32)
    age_ids = jax.random.randint(ks[7], (B, 1), 0, max_age, dtype=jnp.int32)
    gender_ids = jax.random.randint(ks[8], (B, 1), 0, gender_size, dtype=jnp.int32)
    task_ids = jax.random.randint(ks[9], (B, 1), 0, task_size, dtype=jnp.int32)
    position_ids = jnp.tile(jnp.arange(S, dtype=jnp.int32)[None, :], (B, 1))

    # Tolerance: 2-plane bf16 split reconstructs f32 to ~2^-16 relative.
    RTOL, ATOL = 1e-4, 1e-4

    def _ref(ids, table):
        return jnp.take(table, ids.reshape(-1), axis=0).reshape(*ids.shape, hidden)

    # 1) Single-table path (ContinuousEmbedding), resident-table case (1 vocab block).
    out_c = embedding_lookup(cont_ids, cont_tb)
    out_c = jax.block_until_ready(out_c)
    assert out_c.shape == (B, S, hidden)
    assert jnp.allclose(out_c, _ref(cont_ids, cont_tb), rtol=RTOL, atol=ATOL)

    # 2) Fused multi-table path (Age/Gender/Task/Unit/Continuous/Positional):
    #    single pallas_call, stacked vocab spans multiple vocab blocks (exercises
    #    the V-tiled reduction axis + output-accumulator path).
    ids_list = [age_ids, gender_ids, task_ids, unit_ids, cont_ids, position_ids]
    tbs_list = [age_tb, gen_tb, task_tb, unit_tb, cont_tb, pos_tb]
    outs = fused_embedding_lookup(ids_list, tbs_list)
    outs = jax.block_until_ready(outs)
    for ids, tb, out in zip(ids_list, tbs_list, outs):
        assert out.shape == (*ids.shape, hidden)
        assert jnp.allclose(out, _ref(ids, tb), rtol=RTOL, atol=ATOL), "mismatch vs reference"

    print("KERNEL_OK")
</pallas_src>

<mosaic_0001>
module attributes {stable_mosaic.version = 11 : i64} {
  func.func @_onehot_gather_kernel(%arg0: i32, %arg1: i32, %arg2: memref<16x1xi32, #tpu.memory_space<vmem>>, %arg3: memref<128x128xbf16, #tpu.memory_space<vmem>>, %arg4: memref<16x128xf32, #tpu.memory_space<vmem>>) attributes {dimension_semantics = [#tpu.dimension_semantics<parallel>, #tpu.dimension_semantics<arbitrary>], iteration_bounds = array<i64: 1, 1>, scalar_prefetch = 0 : i64, scratch_operands = 0 : i64, tpu.core_type = #tpu.core_type<tc>, window_params = [{transform_indices = @transform_0, window_bounds = array<i64: 16, 1>}, {transform_indices = @transform_1, window_bounds = array<i64: 128, 128>}, {transform_indices = @transform_2, window_bounds = array<i64: 16, 128>}]} {
    %c0 = arith.constant 0 : index
    %c0_0 = arith.constant 0 : index
    %0 = vector.load %arg2[%c0, %c0_0] : memref<16x1xi32, #tpu.memory_space<vmem>>, vector<16x1xi32>
    %c128_i32 = arith.constant 128 : i32
    %1 = arith.muli %arg1, %c128_i32 : i32
    %2 = tpu.iota {dimensions = array<i32: 1>} : vector<16x128xi32>
    %3 = vector.broadcast %1 : i32 to vector<16x128xi32>
    %4 = arith.addi %3, %2 : vector<16x128xi32>
    %5 = vector.broadcast %0 : vector<16x1xi32> to vector<16x128xi32>
    %6 = arith.cmpi eq, %4, %5 : vector<16x128xi32>
    %c64_i32 = arith.constant 64 : i32
    %7 = vector.broadcast %c64_i32 : i32 to vector<16x1xi32>
    %8 = arith.addi %0, %7 : vector<16x1xi32>
    %9 = vector.broadcast %8 : vector<16x1xi32> to vector<16x128xi32>
    %10 = arith.cmpi eq, %4, %9 : vector<16x128xi32>
    %11 = arith.ori %6, %10 : vector<16x128xi1>
    %12 = arith.extui %11 : vector<16x128xi1> to vector<16x128xi32>
    %13 = arith.sitofp %12 : vector<16x128xi32> to vector<16x128xf32>
    %14 = arith.truncf %13 : vector<16x128xf32> to vector<16x128xbf16>
    %c0_1 = arith.constant 0 : index
    %c0_2 = arith.constant 0 : index
    %15 = vector.load %arg3[%c0_1, %c0_2] : memref<128x128xbf16, #tpu.memory_space<vmem>>, vector<128x128xbf16>
    %cst = arith.constant dense<0.000000e+00> : vector<16x128xf32>
    %16 = tpu.matmul %14, %15, %cst {dimension_numbers = #tpu.dot_dimension_numbers<[1], [0], [0], [1], [0, 0, 1, 1], [], []>} : vector<16x128xbf16>, vector<128x128xbf16>, vector<16x128xf32> -> vector<16x128xf32>
    %c0_i32 = arith.constant 0 : i32
    %17 = arith.cmpi eq, %arg1, %c0_i32 : i32
    %18 = arith.extui %17 : i1 to i32
    %c0_i32_3 = arith.constant 0 : i32
    %19 = arith.cmpi ne, %18, %c0_i32_3 : i32
    scf.if %19 {
      %c0_6 = arith.constant 0 : index
      %c0_7 = arith.constant 0 : index
      %23 = vector.load %arg4[%c0_6, %c0_7] : memref<16x128xf32, #tpu.memory_space<vmem>>, vector<16x128xf32>
      tpu.vector_store %arg4[%c0_6, %c0_7], %16 {strides = array<i32>} : memref<16x128xf32, #tpu.memory_space<vmem>>, vector<16x128xf32>,
    } else {
    }
    %c0_i32_4 = arith.constant 0 : i32
    %20 = arith.cmpi ne, %arg1, %c0_i32_4 : i32
    %21 = arith.extui %20 : i1 to i32
    %c0_i32_5 = arith.constant 0 : i32
    %22 = arith.cmpi ne, %21, %c0_i32_5 : i32
    scf.if %22 {
      %c0_6 = arith.constant 0 : index
      %c0_7 = arith.constant 0 : index
      %23 = vector.load %arg4[%c0_6, %c0_7] : memref<16x128xf32, #tpu.memory_space<vmem>>, vector<16x128xf32>
      %24 = arith.addf %23, %16 : vector<16x128xf32>
      %c0_8 = arith.constant 0 : index
      %c0_9 = arith.constant 0 : index
      %25 = vector.load %arg4[%c0_8, %c0_9] : memref<16x128xf32, #tpu.memory_space<vmem>>, vector<16x128xf32>
      tpu.vector_store %arg4[%c0_8, %c0_9], %24 {strides = array<i32>} : memref<16x128xf32, #tpu.memory_space<vmem>>, vector<16x128xf32>,
    } else {
    }
    return
  }
  func.func @transform_0(%arg0: i32, %arg1: i32) -> (i32, i32) {
    %c0_i32 = arith.constant 0 : i32
    %c0_i32_0 = arith.constant 0 : i32
    return %arg0, %c0_i32 : i32, i32
  }
  func.func @transform_1(%arg0: i32, %arg1: i32) -> (i32, i32) {
    %c0_i32 = arith.constant 0 : i32
    %c0_i32_0 = arith.constant 0 : i32
    return %arg1, %c0_i32 : i32, i32
  }
  func.func @transform_2(%arg0: i32, %arg1: i32) -> (i32, i32) {
    %c0_i32 = arith.constant 0 : i32
    %c0_i32_0 = arith.constant 0 : i32
    return %arg0, %c0_i32 : i32, i32
  }
}

</mosaic_0001>

<bundles_post_ra>
// kernel: tpu_custom_call.1
= control target key start
LH: loop header
LB: loop body
LE: loop exit
PB: predicated region body
PF: predicated region fallthrough
CT: control target
= control target key end

     0   :  { %7 = vsyncpa [#allocation3], 0  ;;  %s361_s0 = inlined_call_operand.vmem [shape: s32[16,1], index: 0, kind: input, shape index: {}]   ;;  %s362_s1 = inlined_call_operand.hbm [shape: bf16[128,128], index: 1, kind: input, shape index: {}]   ;;  %s363_s2 = inlined_call_operand.hbm [shape: f32[16,128], index: 2, kind: output, shape index: {}]  }
   0x1   :  { %8 = vsyncpa [#allocation4], 0  ;;  %s306_s9 = smov [#allocation2]   ;;  %s258_s13 = scalar_lea.hbm %s362_s1, 1024 }
   0x2   :  { %s16_s10 = sshll.u32 %s306_s9, 4  ;;  %p259_p0 = scmp.ne.s32.totalorder %s362_s1, %s258_s13  ;;  %s17_s10 = int_to_ptr.vmem [resolvable:$true] %s16_s10 }
   0x3   :  { %p262_p1 = scmp.lt.u32.totalorder %s258_s13, %s362_s1 }
   0x5   :  { %p264_p2 = pnand %p262_p1, %p259_p0 }
   0x7   :  { %267 = shalt.err (!%p264_p2)
}
   0x8   :  { %s268_s18 = scalar_lea.vmem %s17_s10, 1024  ;;  %p273_p4 = scmp.lt.s32.totalorder %s17_s10, %s17_s10 }
   0x9   :  { %p269_p3 = scmp.ne.s32.totalorder %s17_s10, %s268_s18  ;;  %p274_p5 = scmp.lt.s32.totalorder %s268_s18, %s268_s18 }
   0xb   :  { %p275_p6 = por %p274_p5, %p273_p4 }
   0xd   :  { %p276_p7 = pnand %p275_p6, %p269_p3 }
   0xf   :  { %279 = shalt.err (!%p276_p7)
}
  0x10   :  { %s307_s19 = smov 64   ;;  %s308_s20 = smov 4  }
  0x11   :  { %22 = dma.hbm_to_vmem [thread:$0]  %s362_s1, 1024, %s17_s10, [#allocation3], %s307_s19, %s307_s19, %s308_s20  }
  0x12   :  { %302 = dma.done.wait [#allocation3], 1024  }
  0x13   :  { %303 = vsyncadd [#allocation3], 4294966272  ;;  %v309_v0 = vmov 0   ;;  %v310_v1 = vmov 0.0   ;;  %v27_v2 = vld [vmem:[%s361_s0] sm:$0xff]  ;;  %v28_v3 = vld [vmem:[%s361_s0 + $0x8] sm:$0xff]  ;;  %v30_v14 = vlaneseq }
  0x14   :  { %248 = vset.pattern.permute.xlu0 %v309_v0  ;;  %249 = vset.pattern.permute.xlu1 %v309_v0  ;;  %v42_v4 = vadd.s32 64, %v27_v2  ;;  %v250_v5 = vld [vmem:[#allocation2] sm:$0xff]   ;;  %v43_v6 = vadd.s32 64, %v28_v3  ;;  %v251_v7 = vld [vmem:[#allocation2 + $0x8] sm:$0xff]   ;;  %v252_v8 = vld [vmem:[#allocation2 + $0x10] sm:$0xff]   ;;  %vm311_vm0 = vmmov 0  }
  0x15   :  { %218 = vmatprep.subr.bf16.mxu0 %v310_v1  ;;  %35 = vperm.xlu0 %248, %v27_v2   ;;  %v253_v9 = vld [vmem:[#allocation2 + $0x18] sm:$0xff]   ;;  %v254_v10 = vld [vmem:[#allocation2 + $0x20] sm:$0xff]   ;;  %v255_v11 = vld [vmem:[#allocation2 + $0x28] sm:$0xff]   ;;  %v31_v15 = vand.u32 127, %v30_v14  ;;  %v312_v20 = vmov 1.0|1.0  }
  0x16   :  { %45 = vperm.xlu1 %249, %v42_v4   ;;  %219 = vmatpush3.bf16.msra.mxu0 %v250_v5  ;;  %v256_v12 = vld [vmem:[#allocation2 + $0x30] sm:$0xff]   ;;  %v257_v13 = vld [vmem:[#allocation2 + $0x38] sm:$0xff]   ;;  %s313_s0 = smov [#allocation5]  }
  0x17   :  { %220 = vmatprep.subr.bf16.mxu0 %v310_v1  ;;  %234 = vmatprep.mubr.msk.bf16.mxu0 %vm311_vm0, %v310_v1  ;;  %s185_s1 = sshll.u32 %s313_s0, 4  ;;  %s186_s1 = int_to_ptr.vmem [resolvable:$true] %s185_s1 }
  0x18   :  { %s280_s27 = scalar_lea.vmem %s186_s1, 256  ;;  %p285_p9 = scmp.lt.s32.totalorder %s186_s1, %s186_s1 }
  0x19   :  { %38 = vperm.xlu0 %248, %v28_v3   ;;  %p281_p8 = scmp.ne.s32.totalorder %s186_s1, %s280_s27  ;;  %p286_p10 = scmp.lt.s32.totalorder %s280_s27, %s280_s27 }
  0x1a   :  { %48 = vperm.xlu1 %249, %v43_v6   ;;  %221 = vmatpush3.bf16.msra.mxu0 %v251_v7 }
  0x1b   :  { %222 = vmatprep.subr.bf16.mxu0 %v310_v1  ;;  %p287_p11 = por %p286_p10, %p285_p9 }
  0x1d   :  { %p288_p12 = pnand %p287_p11, %p281_p8 }
  0x1e   :  { %223 = vmatpush3.bf16.msra.mxu0 %v252_v8 }
  0x1f   :  { %224 = vmatprep.subr.bf16.mxu0 %v310_v1 }
  0x22   :  { %225 = vmatpush3.bf16.msra.mxu0 %v253_v9 }
  0x23   :  { %226 = vmatprep.subr.bf16.mxu0 %v310_v1 }
  0x26   :  { %227 = vmatpush3.bf16.msra.mxu0 %v254_v10 }
  0x27   :  { %228 = vmatprep.subr.bf16.mxu0 %v310_v1 }
  0x2a   :  { %229 = vmatpush3.bf16.msra.mxu0 %v255_v11 }
  0x2b   :  { %230 = vmatprep.subr.bf16.mxu0 %v310_v1 }
  0x2e   :  { %231 = vmatpush3.bf16.msra.mxu0 %v256_v12 }
  0x2f   :  { %232 = vmatprep.subr.bf16.mxu0 %v310_v1 }
  0x32   :  { %233 = vmatpush3.bf16.msra.mxu0 %v257_v13 }
  0x94   :  { %v36_v16 = vpop.permute.xlu0 %35 }
  0x95   :  { %v46_v17 = vpop.permute.xlu1 %45  ;;  %vm40_vm1 = vcmp.eq.s32.totalorder %v31_v15, %v36_v16 }
  0x96   :  { %vm50_vm2 = vcmp.eq.s32.totalorder %v31_v15, %v46_v17 }
  0x97   :  { %vm52_vm3 = vmor %vm40_vm1, %vm50_vm2 }
  0x98   :  { %v39_v18 = vpop.permute.xlu0 %38 }
  0x99   :  { %v49_v19 = vpop.permute.xlu1 %48  ;;  %vm41_vm4 = vcmp.eq.s32.totalorder %v31_v15, %v39_v18 }
  0x9a   :  { %vm51_vm5 = vcmp.eq.s32.totalorder %v31_v15, %v49_v19 }
  0x9b   :  { %vm53_vm6 = vmor %vm41_vm4, %vm51_vm5 }
  0x9c   :  { %vm207_vm7 = vmpackc.low %vm53_vm6, %vm52_vm3 }
  0x9d   :  { %235 = vmatmul.mubr.msk.bf16.vlgmr.msra.gmra.mrb[0].mxu0 %vm207_vm7, %v312_v20 }
 0x170   :  { %v157_v21 = vpop.f32.mrb[0].mxu0 }
 0x171   :  { %168 = vst [vmem:[#allocation5] sm:$0xff] %v157_v21  ;;  %v236_v22 = vpop.f32.mrb[1].mxu0 }
 0x172   :  { %v160_v23 = vpop.f32.mrb[2].mxu0 }
 0x173   :  { %169 = vst [vmem:[#allocation5 + $0x8] sm:$0xff] %v160_v23  ;;  %v237_v24 = vpop.f32.mrb[3].mxu0 }
 0x174   :  { %291 = shalt.err (!%p288_p12)
}
 0x175   :  { %s292_s30 = scalar_lea.hbm %s363_s2, 256 }
 0x176   :  { %p293_p13 = scmp.ne.s32.totalorder %s363_s2, %s292_s30  ;;  %p296_p0 = scmp.lt.u32.totalorder %s292_s30, %s363_s2 }
 0x178   :  { %p298_p1 = pnand %p296_p0, %p293_p13 }
 0x17a   :  { %301 = shalt.err (!%p298_p1)
}
 0x17b   :  { %s314_s7 = smov 128   ;;  %s315_s8 = smov 8  }
 0x17c   :  { %191 = dma.vmem_to_hbm [thread:$0]  %s186_s1, 256, %s363_s2, [#allocation4], %s314_s7, %s314_s7, %s315_s8  }
 0x17d   :  { %304 = dma.done.wait [#allocation4], 256  }
 0x17e   :  { %305 = vsyncadd [#allocation4], 4294967040 }
 0x17f   :  { %195 = vsyncpa [#allocation3], 1 }
 0x180   :  { %196 = vsyncpa [#allocation4], 1 }

</bundles_post_ra>
